<compile_context>
chip_gen: v6e
topology: v6e:2x2x1
jax: 0.10.0
libtpu: 0.0.40
codegen_flags: <defaults>
</compile_context>

<pallas_src>
import functools
import math

import jax
import jax.numpy as jnp
from jax.experimental import pallas as pl
from jax.experimental.pallas import tpu as pltpu


# ---------------------------------------------------------------------------
# Kernel
# ---------------------------------------------------------------------------
def _avgpool_lane_kernel(x_ref, o_ref, *, r: int, h: int, g: int):
    """Average r adjacent timesteps that were folded into the lane axis.

    x_ref: (t_tile, g*r*h) VMEM tile  -- g groups, each r windows of width h.
    o_ref: (t_tile, g*h)   VMEM tile  -- lane-dense when (g*h) % 128 == 0.
    """
    inv_r = jnp.float32(1.0 / r)
    cols = []
    for j in range(g):
        base = j * r * h
        acc = x_ref[:, base:base + h].astype(jnp.float32)
        for i in range(1, r):
            acc = acc + x_ref[:, base + i * h:base + (i + 1) * h].astype(jnp.float32)
        cols.append(acc)
    out = cols[0] if g == 1 else jnp.concatenate(cols, axis=-1)
    o_ref[...] = (out * inv_r).astype(o_ref.dtype)


# ---------------------------------------------------------------------------
# Sizing helpers ((8,128)-padding aware)
# ---------------------------------------------------------------------------
def _round_up(x: int, m: int) -> int:
    return ((x + m - 1) // m) * m


def _min_sublanes(itemsize: int) -> int:
    # Sublane packing: f32 -> 8 rows, bf16/f16 -> 16, int8/fp8 -> 32.
    return {4: 8, 2: 16, 1: 32}.get(itemsize, 8)


def _padded_tile_bytes(rows: int, cols: int, itemsize: int) -> int:
    sub = _min_sublanes(itemsize)
    return _round_up(max(rows, 1), sub) * _round_up(max(cols, 1), 128) * itemsize


def _vmem_capacity_bytes() -> int:
    try:
        info = pltpu.get_tpu_info()
        cap = int(getattr(info, "vmem_capacity_bytes", 0) or 0)
        if cap > 0:
            return cap
    except Exception:
        pass
    return 64 << 20  # conservative fallback (v7x per-TensorCore VMEM)


def _choose_t_tile(n: int, batch: int, in_cols: int, out_cols: int,
                   itemsize: int, target_in_bytes: int, vmem_cap: int) -> int:
    """Rows (along the pooled-time axis) per grid step."""
    sub = _min_sublanes(itemsize)
    if n <= sub:
        return n                                     # full extent (always legal)

    in_row_bytes = _round_up(in_cols, 128) * itemsize
    rows = max(sub, (target_in_bytes // in_row_bytes) // sub * sub)
    if rows >= n:
        rows = n

    # Double-buffered, padding-aware VMEM fit with headroom for compiler scratch.
    usable = max(vmem_cap - (16 << 20), 8 << 20)

    def footprint(rw: int) -> int:
        return 2 * (_padded_tile_bytes(rw, in_cols, itemsize) +
                    _padded_tile_bytes(rw, out_cols, itemsize))

    while rows > sub and footprint(rows) > usable:
        rows = max(sub, (rows // 2) // sub * sub)

    # Guarantee enough grid steps for DMA/compute overlap and megacore sharding.
    target_steps = 8
    if rows > sub and batch * pl.cdiv(n, rows) < target_steps:
        desired_tiles = pl.cdiv(target_steps, batch)
        new_rows = max(sub, _round_up(pl.cdiv(n, desired_tiles), sub))
        rows = n if new_rows >= n else new_rows
    return rows


# ---------------------------------------------------------------------------
# Public entry point
# ---------------------------------------------------------------------------
def downsample(x: jax.Array,
               reduction_factor: int = 2,
               *,
               use_pallas: bool | None = None,
               block_bytes: int | None = None) -> jax.Array:
    """AvgPool1d(kernel=stride=reduction_factor) over axis 1 of (B, T, H)."""
    B, T, H = x.shape
    r = int(reduction_factor)
    t_out = T // r
    if t_out == 0:
        return jnp.zeros((B, 0, H), x.dtype)
    if r == 1:
        return x

    itemsize = jnp.dtype(x.dtype).itemsize
    if use_pallas is None:
        # Below a few MiB the fused-XLA path beats pallas_call launch overhead.
        use_pallas = (B * T * H * itemsize) >= (4 << 20)
    if not use_pallas:
        return downsample_ref(x, r)

    # Lane grouping: fold g pooled timesteps into lanes so the output block's
    # last dim is a multiple of 128 (dense stores, no lane padding).  Only when
    # the reshape is free, i.e. t_out is a multiple of g.
    g = 1
    if H % 128 != 0:
        g_full = 128 // math.gcd(H, 128)             # smallest g with g*H % 128 == 0
        if 1 < g_full <= 16 and (t_out % g_full == 0):
            g = g_full

    if t_out * r != T:
        # TODO(synk): rare edge case (T % r != 0); costs one extra HBM pass.
        x = jax.lax.slice_in_dim(x, 0, t_out * r, axis=1)

    n = t_out // g
    in_cols = g * r * H
    out_cols = g * H
    x2 = x.reshape(B, n, in_cols)                     # free row-major reshape

    vmem_cap = _vmem_capacity_bytes()
    if block_bytes is None:
        # Generation-aware default: bigger steps where VMEM allows (v5e/v6e).
        block_bytes = (12 << 20) if vmem_cap >= (96 << 20) else (6 << 20)

    t_tile = _choose_t_tile(n, B, in_cols, out_cols, itemsize, block_bytes, vmem_cap)
    grid = (B, pl.cdiv(n, t_tile))

    pin = _padded_tile_bytes(t_tile, in_cols, itemsize)
    pout = _padded_tile_bytes(t_tile, out_cols, itemsize)
    vmem_limit = int(min(vmem_cap, max(2 * (pin + pout) + (16 << 20), 32 << 20)))

    kernel = functools.partial(_avgpool_lane_kernel, r=r, h=H, g=g)

    out = pl.pallas_call(
        kernel,
        out_shape=jax.ShapeDtypeStruct((B, n, out_cols), x.dtype),
        grid_spec=pltpu.PrefetchScalarGridSpec(
            num_scalar_prefetch=0,
            grid=grid,
            in_specs=[pl.BlockSpec((None, t_tile, in_cols), lambda b, t: (b, t, 0))],
            out_specs=pl.BlockSpec((None, t_tile, out_cols), lambda b, t: (b, t, 0)),
        ),
        compiler_params=pltpu.CompilerParams(
            dimension_semantics=("parallel", "parallel"),
            vmem_limit_bytes=vmem_limit,
        ),
    )(x2)

    return out.reshape(B, t_out, H) if g > 1 else out


def downsample_ref(x: jax.Array, reduction_factor: int = 2) -> jax.Array:
    """Pure-JAX reference matching torch AvgPool1d semantics."""
    B, T, H = x.shape
    r = reduction_factor
    t_out = T // r
    x = x[:, : t_out * r, :].reshape(B, t_out, r, H)
    return jnp.mean(x, axis=2)


if __name__ == "__main__":
    key = jax.random.PRNGKey(0)
    k1, k2, k3, k4 = jax.random.split(key, 4)

    # Module config: Downsample(hidden_dim=32, reduction_factor=2); input (B, T, H).
    B, T, H = 2, 16, 32
    x = jax.random.normal(k1, (B, T, H), dtype=jnp.float32)
    out = jax.block_until_ready(downsample(x, 2, use_pallas=True))
    ref = downsample_ref(x, 2)
    assert out.shape == (B, T // 2, H), out.shape
    assert jnp.allclose(out, ref, atol=1e-6, rtol=1e-6), "mismatch (tiny, grouped)"

    # Grouped lane-dense path with several T tiles and a ragged last block.
    x2 = jax.random.normal(k2, (2, 1296, 32), dtype=jnp.float32)
    out2 = jax.block_until_ready(downsample(x2, 2, use_pallas=True, block_bytes=64 * 1024))
    ref2 = downsample_ref(x2, 2)
    assert out2.shape == ref2.shape
    assert jnp.allclose(out2, ref2, atol=1e-6, rtol=1e-6), "mismatch (grouped, tiled)"

    # Ungrouped fallback (t_out not a multiple of g) with ragged tiling.
    x3 = jax.random.normal(k3, (2, 1202, 32), dtype=jnp.float32)
    out3 = jax.block_until_ready(downsample(x3, 2, use_pallas=True, block_bytes=64 * 1024))
    ref3 = downsample_ref(x3, 2)
    assert out3.shape == ref3.shape
    assert jnp.allclose(out3, ref3, atol=1e-6, rtol=1e-6), "mismatch (ungrouped)"

    # Odd T (T % r != 0) -> trim branch, then grouped path.
    x4 = jax.random.normal(k4, (2, 1201, 32), dtype=jnp.float32)
    out4 = jax.block_until_ready(downsample(x4, 2, use_pallas=True, block_bytes=64 * 1024))
    ref4 = downsample_ref(x4, 2)
    assert out4.shape == ref4.shape
    assert jnp.allclose(out4, ref4, atol=1e-6, rtol=1e-6), "mismatch (odd T)"

    print("KERNEL_OK")
</pallas_src>

<mosaic_0001>
module attributes {stable_mosaic.version = 11 : i64} {
  func.func @_avgpool_lane_kernel(%arg0: i32, %arg1: i32, %arg2: memref<1x2x256xf32, #tpu.memory_space<vmem>>, %arg3: memref<1x2x128xf32, #tpu.memory_space<vmem>>) attributes {dimension_semantics = [#tpu.dimension_semantics<parallel>, #tpu.dimension_semantics<parallel>], iteration_bounds = array<i64: 2, 1>, scalar_prefetch = 0 : i64, scratch_operands = 0 : i64, tpu.core_type = #tpu.core_type<tc>, window_params = [{transform_indices = @transform_0, window_bounds = array<i64: 1, 2, 256>}, {transform_indices = @transform_1, window_bounds = array<i64: 1, 2, 128>}]} {
    %c0 = arith.constant 0 : index
    %c0_0 = arith.constant 0 : index
    %c0_1 = arith.constant 0 : index
    %0 = vector.load %arg2[%c0, %c0_0, %c0_1] : memref<1x2x256xf32, #tpu.memory_space<vmem>>, vector<1x2x32xf32>
    %1 = vector.shape_cast %0 : vector<1x2x32xf32> to vector<2x32xf32>
    %c0_2 = arith.constant 0 : index
    %c0_3 = arith.constant 0 : index
    %c32 = arith.constant 32 : index
    %2 = vector.load %arg2[%c0_2, %c0_3, %c32] : memref<1x2x256xf32, #tpu.memory_space<vmem>>, vector<1x2x32xf32>
    %3 = vector.shape_cast %2 : vector<1x2x32xf32> to vector<2x32xf32>
    %4 = arith.addf %1, %3 : vector<2x32xf32>
    %c0_4 = arith.constant 0 : index
    %c0_5 = arith.constant 0 : index
    %c64 = arith.constant 64 : index
    %5 = vector.load %arg2[%c0_4, %c0_5, %c64] : memref<1x2x256xf32, #tpu.memory_space<vmem>>, vector<1x2x32xf32>
    %6 = vector.shape_cast %5 : vector<1x2x32xf32> to vector<2x32xf32>
    %c0_6 = arith.constant 0 : index
    %c0_7 = arith.constant 0 : index
    %c96 = arith.constant 96 : index
    %7 = vector.load %arg2[%c0_6, %c0_7, %c96] : memref<1x2x256xf32, #tpu.memory_space<vmem>>, vector<1x2x32xf32>
    %8 = vector.shape_cast %7 : vector<1x2x32xf32> to vector<2x32xf32>
    %9 = arith.addf %6, %8 : vector<2x32xf32>
    %c0_8 = arith.constant 0 : index
    %c0_9 = arith.constant 0 : index
    %c128 = arith.constant 128 : index
    %10 = vector.load %arg2[%c0_8, %c0_9, %c128] : memref<1x2x256xf32, #tpu.memory_space<vmem>>, vector<1x2x32xf32>
    %11 = vector.shape_cast %10 : vector<1x2x32xf32> to vector<2x32xf32>
    %c0_10 = arith.constant 0 : index
    %c0_11 = arith.constant 0 : index
    %c160 = arith.constant 160 : index
    %12 = vector.load %arg2[%c0_10, %c0_11, %c160] : memref<1x2x256xf32, #tpu.memory_space<vmem>>, vector<1x2x32xf32>
    %13 = vector.shape_cast %12 : vector<1x2x32xf32> to vector<2x32xf32>
    %14 = arith.addf %11, %13 : vector<2x32xf32>
    %c0_12 = arith.constant 0 : index
    %c0_13 = arith.constant 0 : index
    %c192 = arith.constant 192 : index
    %15 = vector.load %arg2[%c0_12, %c0_13, %c192] : memref<1x2x256xf32, #tpu.memory_space<vmem>>, vector<1x2x32xf32>
    %16 = vector.shape_cast %15 : vector<1x2x32xf32> to vector<2x32xf32>
    %c0_14 = arith.constant 0 : index
    %c0_15 = arith.constant 0 : index
    %c224 = arith.constant 224 : index
    %17 = vector.load %arg2[%c0_14, %c0_15, %c224] : memref<1x2x256xf32, #tpu.memory_space<vmem>>, vector<1x2x32xf32>
    %18 = vector.shape_cast %17 : vector<1x2x32xf32> to vector<2x32xf32>
    %19 = arith.addf %16, %18 : vector<2x32xf32>
    %20 = tpu.concatenate %4, %9, %14, %19 in 1 : vector<2x32xf32>, vector<2x32xf32>, vector<2x32xf32>, vector<2x32xf32> -> vector<2x128xf32>
    %cst = arith.constant 5.000000e-01 : f32
    %21 = vector.broadcast %cst : f32 to vector<2x128xf32>
    %22 = arith.mulf %20, %21 : vector<2x128xf32>
    %c0_16 = arith.constant 0 : index
    %c0_17 = arith.constant 0 : index
    %c0_18 = arith.constant 0 : index
    %23 = vector.load %arg3[%c0_16, %c0_17, %c0_18] : memref<1x2x128xf32, #tpu.memory_space<vmem>>, vector<1x2x128xf32>
    %24 = vector.shape_cast %23 : vector<1x2x128xf32> to vector<2x128xf32>
    %25 = vector.shape_cast %22 : vector<2x128xf32> to vector<1x2x128xf32>
    tpu.vector_store %arg3[%c0_16, %c0_17, %c0_18], %25 {strides = array<i32>} : memref<1x2x128xf32, #tpu.memory_space<vmem>>, vector<1x2x128xf32>,
    return
  }
  func.func @transform_0(%arg0: i32, %arg1: i32) -> (i32, i32, i32) {
    %c0_i32 = arith.constant 0 : i32
    %c0_i32_0 = arith.constant 0 : i32
    return %arg0, %arg1, %c0_i32 : i32, i32, i32
  }
  func.func @transform_1(%arg0: i32, %arg1: i32) -> (i32, i32, i32) {
    %c0_i32 = arith.constant 0 : i32
    %c0_i32_0 = arith.constant 0 : i32
    return %arg0, %arg1, %c0_i32 : i32, i32, i32
  }
}

</mosaic_0001>

<bundles_post_ra>
// kernel: tpu_custom_call.1
= control target key start
LH: loop header
LB: loop body
LE: loop exit
PB: predicated region body
PF: predicated region fallthrough
CT: control target
= control target key end

     0   :  { %6 = vsyncpa [#allocation3], 0  ;;  %s635_s0 = inlined_call_operand.hbm [shape: f32[2,2,256], index: 0, kind: input, shape index: {}]   ;;  %s636_s1 = inlined_call_operand.hbm [shape: f32[2,2,128], index: 1, kind: output, shape index: {}]  }
   0x1   :  { %8 = vsyncpa [#allocation3 + $0x1], 0 }
   0x2   :  { %9 = vsyncpa [#allocation4], 0 }
   0x3   :  { %11 = vsyncpa [#allocation4 + $0x1], 0  ;;  %s500_s6 = smov 0   ;;  %s502_s7 = smov 0  }
   0x4   :  { %s504_s8 = smov 0   ;;  %s506_s9 = smov 0  }
   0x5   :  { %s508_s10 = smov 0   ;;  %s510_s11 = smov 0  }
   0x6 LB: > { %s293_s12 = sadd.s32 4294967295, %s482_s11   ;;  %s294_s13 = sadd.s32 4294967294, %s482_s11   ;;  %s482_s11 = sphi %s510_s11, %s17_s11   ;;  %s478_s10 = sphi %s508_s10, %s648_s10   ;;  %s474_s9 = sphi %s506_s9, %s647_s9   ;;  %s470_s8 = sphi %s504_s8, %s646_s8   ;;  %s466_s7 = sphi %s502_s7, %s645_s7   ;;  %s462_s6 = sphi %s500_s6, %s644_s6  }
   0x7   : > { %s29_s14 = sadd.s32 1, %s478_s10  ;;  %s38_s15 = sadd.s32 1, %s470_s8 }
   0x8   : > { %p31_p0 = scmp.ge.s32.totalorder %s29_s14, 2  ;;  %p45_p1 = scmp.ne.s32.totalorder %s470_s8, %s466_s7 }
   0x9   : > { %p46_p2 = scmp.eq.s32.totalorder %s482_s11, 0  ;;  %p51_p3 = scmp.ne.s32.totalorder %s466_s7, %s462_s6 }
   0xa   : > { %s650_s14 = smov (%p31_p0, %s29_s14), 0  ;;  %p52_p5 = scmp.eq.s32.totalorder %s293_s12, 0 }
   0xb   : > { %p541_p4 = por %p46_p2, %p45_p1  ;;  %s33_s17 = ssub.s32 %s478_s10, %s650_s14 }
   0xc   : > { %p77_p6 = scmp.eq.s32.totalorder %s293_s12, 1  ;;  %p36_p7 = scmp.eq.s32.totalorder %s33_s17, 0 }
   0xd   : > { %p547_p8 = por %p52_p5, %p51_p3  ;;  %p83_p10 = scmp.eq.s32.totalorder %s294_s13, 1 }
   0xe   : > { %p551_p9 = por %p77_p6, %p45_p1  ;;  %p320_p13 = scmp.lt.s32.totalorder %s482_s11, 2 }
   0xf   : > { %s556_s20 = scalar_select %p36_p7, %s470_s8, %s38_s15  }
  0x10   : > { %p558_p11 = por %p83_p10, %p51_p3  ;;  %s103_s22 = sand.u32 1, %s470_s8  }
  0x11   : > { %s297_s23 = sshll.u32 %s103_s22, 2  ;;  %s307_s24 = sshll.u32 %s478_s10, 6 }
  0x12   : > { %s640_s21 = scalar_select %p558_p11, 1, 0 }
  0x13   : > { %s115_s27 = scalar_lea.hbm %s635_s0, %s307_s24  ;;  %s107_s28 = scalar_lea.vmem [#allocation2], %s297_s23 }
  0x14   : > { %s117_s29 = sshll.u32 %s107_s28, 4  ;;  %p571_p0 = pnand %p320_p13, %p541_p4  ;;  %s118_s29 = int_to_ptr.vmem [resolvable:$true] %s117_s29 }
  0x15   : > { %p300_p1 = scmp.ge.s32.totalorder %s482_s11, 1  ;;  %p122_p2 = scmp.lt.s32.totalorder %s482_s11, 3 }
  0x16   : > { %s104_s2 = scalar_lea.sflag [#allocation3], %s103_s22  ;;  %p376_p3 = pneg %p571_p0 }
  0x17   : > { %s387_s3 = scalar_lea.vmem %s118_s29, 64  ;;  %s484_s4 = smov [#allocation2]  }
  0x18   : > { %p388_p5 = scmp.ne.s32.totalorder %s118_s29, %s387_s3  ;;  %s392_s5 = sshll.u32 %s484_s4, 4  ;;  %s393_s5 = int_to_ptr.vmem [resolvable:$false] %s392_s5 }
  0x19   : > { %s394_s12 = scalar_lea.vmem %s393_s5, 128  ;;  %p395_p10 = scmp.lt.s32.totalorder %s118_s29, %s393_s5 }
  0x1a   : > { %p390_p6 = pnand %p388_p5, %p376_p3  ;;  %p396_p12 = scmp.lt.s32.totalorder %s394_s12, %s387_s3 }
  0x1c   : > { %p391_p7 = pneg %p390_p6  ;;  %p397_p4 = por %p396_p12, %p395_p10 }
  0x1e   : > { %p398_p13 = pnand %p397_p4, %p391_p7 }
  0x20   : > { %401 = shalt.err (!%p398_p13)
}
  0x21   : > { %315 = dma.hbm_to_vmem [thread:$0]  (!%p571_p0), %s115_s27, 64, %s118_s29, %s104_s2  }
  0x22   : > { %p123_p11 = pnand %p300_p1, %p122_p2 }
  0x23   : > { %s586_s13 = sand.u32 (!%p123_p11), 1, %s466_s7  }
  0x24   : > { %126 = sbr.rel (%p123_p11) target bundleno = 298 (0x12a), region = 24  ;;  %s301_s15 = sshll.u32 (!%p123_p11), %s586_s13, 2 }
  0x25   : > { %s129_s16 = scalar_lea.sflag (!%p123_p11), [#allocation3], %s586_s13  ;;  %s132_s17 = scalar_lea.vmem (!%p123_p11), [#allocation2], %s301_s15 }
  0x29   : > { %453 = dma.done.wait (%p547_p8), %s129_s16, 64  }
  0x2a   : > { %455 = vsyncadd (%p547_p8), %s129_s16, 4294967232  ;;  %v151_v0 = vld [vmem:[%s132_s17] sm:$0x3]  ;;  %s485_s22 = smov 96   ;;  %v157_v1 = vld [vmem:[%s132_s17 + $0x2] sm:$0x3]  ;;  %v167_v4 = vlaneseq }
  0x2b   : > { %153 = vrot.lane.b32.xlu0 %v151_v0, %s485_s22  ;;  %v486_v2 = vmov 1983009808   ;;  %s487_s18 = smov 32   ;;  %s488_s23 = smov 64   ;;  %vm188_vm0 = vcmask 261120   ;;  %vm190_vm1 = vcmask 523264  }
  0x2c   : > { %v165_v3 = vunpack.c.l.s4 %v486_v2  ;;  %v168_v6 = vshrl.u32 %v167_v4, 7  ;;  %s302_s24 = sshll.u32 %s586_s13, 1  ;;  %vm192_vm2 = vcmask 785408   ;;  %s304_s25 = sshll.u32 %s474_s9, 5 }
  0x2d   : > { %s150_s26 = scalar_lea.vmem [#allocation5], %s302_s24  ;;  %s209_s30 = scalar_lea.hbm %s636_s1, %s304_s25 }
  0x2e   : > { %v166_v5 = vunpack.c.0.s8 %v165_v3  ;;  %s211_s27 = sshll.u32 %s150_s26, 4  ;;  %s197_s2 = scalar_lea.sflag [#allocation4], %s586_s13  ;;  %s212_s27 = int_to_ptr.vmem [resolvable:$true] %s211_s27 }
  0x2f   : > { %159 = vrot.lane.b32.xlu0 %v157_v1, %s485_s22  ;;  %s402_s3 = scalar_lea.vmem %s212_s27, 32  ;;  %s489_s4 = smov [#allocation5]  }
  0x30   : > { %v169_v7 = vsub.s32 %v166_v5, %v168_v6  ;;  %p403_p8 = scmp.ne.s32.totalorder %s212_s27, %s402_s3  ;;  %s406_s5 = sshll.u32 %s489_s4, 4  ;;  %s407_s5 = int_to_ptr.vmem [resolvable:$false] %s406_s5 }
  0x31   : > { %s408_s9 = scalar_lea.vmem %s407_s5, 64  ;;  %p409_p0 = scmp.lt.s32.totalorder %s212_s27, %s407_s5 }
  0x32   : > { %p404_p11 = pnand %p403_p8, %p551_p9  ;;  %p410_p1 = scmp.lt.s32.totalorder %s408_s9, %s402_s3 }
  0x34   : > { %p405_p12 = pneg %p404_p11  ;;  %p411_p2 = por %p410_p1, %p409_p0 }
  0x36   : > { %p412_p3 = pnand %p411_p2, %p405_p12 }
  0x9d   : > { %v154_v8 = vpop.permute.xlu0 %153 }
  0x9e   : > { %v156_v9 = vadd.f32 %v154_v8, %v151_v0 }
  0xa0   : > { %v170_v10 = vrot.slane %v156_v9, %v169_v7 }
  0xa1   : > { %v160_v11 = vpop.permute.xlu0 %159 }
  0xa2   : > { %v162_v12 = vadd.f32 %v160_v11, %v157_v1  ;;  %171 = vrot.lane.b32.xlu1 %v170_v10, %s485_s22 }
  0xa4   : > { %v181_v13 = vrot.slane %v162_v12, %v169_v7 }
  0xa6   : > { %185 = vrot.lane.b32.xlu0 %v181_v13, %s487_s18  ;;  %182 = vrot.lane.b32.xlu1 %v181_v13, %s488_s23 }
 0x114   : > { %v172_v14 = vpop.permute.xlu1 %171 }
 0x115   : > { %v189_v15 = vsel %vm188_vm0, %v156_v9, %v172_v14 }
 0x118   : > { %v186_v16 = vpop.permute.xlu0 %185  ;;  %v183_v17 = vpop.permute.xlu1 %182 }
 0x119   : > { %v191_v18 = vsel %vm190_vm1, %v189_v15, %v183_v17 }
 0x11a   : > { %v193_v19 = vsel %vm192_vm2, %v191_v18, %v186_v16 }
 0x11b   : > { %v194_v20 = vmul.f32 0.5, %v193_v19 }
 0x11d   : > { %195 = vst [vmem:[%s150_s26] sm:$0x3] %v194_v20 }
 0x11e   : > { %415 = shalt.err (!%p412_p3)
}
 0x11f   : > { %s416_s12 = scalar_lea.hbm %s209_s30, 32  ;;  %s420_s16 = scalar_lea.hbm %s636_s1, 64 }
 0x120   : > { %p417_p5 = scmp.ne.s32.totalorder %s209_s30, %s416_s12  ;;  %p421_p10 = scmp.lt.s32.totalorder %s209_s30, %s636_s1 }
 0x121   : > { %p422_p4 = scmp.lt.s32.totalorder %s420_s16, %s416_s12 }
 0x122   : > { %p418_p6 = pnand %p417_p5, %p551_p9 }
 0x123   : > { %p423_p13 = por %p422_p4, %p421_p10 }
 0x124   : > { %p419_p7 = pneg %p418_p6 }
 0x126   : > { %p424_p8 = pnand %p423_p13, %p419_p7 }
 0x128   : > { %427 = shalt.err (!%p424_p8)
}
 0x129   : > { %310 = dma.vmem_to_hbm [thread:$0]  (%p551_p9), %s212_s27, 32, %s209_s30, %s197_s2  }
 0x12a PF: > { %s223_s18 = sand.u32 1, %s462_s6   ;;  %p642_p11 = scmp.ne.s32.totalorder %s640_s21, 0 }
 0x12b   : > { %p643_p12 = scmp.ge.s32.totalorder %s482_s11, 2  ;;  %s224_s23 = scalar_lea.sflag [#allocation4], %s223_s18 }
 0x12d   : > { %p317_p0 = pnand %p643_p12, %p642_p11 }
 0x12f   : > { %p318_p1 = pneg %p317_p0 }
 0x131   : > { %457 = dma.done.wait (%p318_p1), %s224_s23, 32  }
 0x132   : > { %459 = vsyncadd (%p318_p1), %s224_s23, 4294967264  ;;  %s17_s11 = sadd.s32 1, %s482_s11   ;;  %s644_s6 = smov %s466_s7 }
 0x133   : > { %p14_p2 = scmp.ge.s32.totalorder %s17_s11, 4   ;;  %s645_s7 = smov %s470_s8 }
 0x134   : > { %s646_s8 = smov %s556_s20  ;;  %s647_s9 = smov %s478_s10 }
 0x135   : > { %s648_s10 = smov %s650_s14  ;;  %16 = sbr.rel (!%p14_p2) target bundleno = 6 (0x6), region = 69 }
 0x13a   :  { %229 = vsyncpa [#allocation3], 1 }
 0x13b   :  { %231 = vsyncpa [#allocation3 + $0x1], 1 }
 0x13c   :  { %232 = vsyncpa [#allocation4], 1 }
 0x13d   :  { %234 = vsyncpa [#allocation4 + $0x1], 1 }

</bundles_post_ra>
